<compile_context>
chip_gen: v7x
topology: tpu7x:2x2x1
jax: 0.10.0
libtpu: 0.0.40
codegen_flags: <defaults>
</compile_context>

<pallas_src>
import functools

import jax
import jax.numpy as jnp
from jax.experimental import pallas as pl
from jax.experimental.pallas import tpu as pltpu

_NUM_CORE_SPLITS = 2              # leading "parallel" grid axis: 2-TC split on v7x, ~free elsewhere
_VMEM_BUDGET = 40 * 1024 * 1024   # target in-kernel working set (fits v7x's 64 MiB physical VMEM)
_VMEM_LIMIT = 48 * 1024 * 1024    # explicit scoped-VMEM limit handed to Mosaic
_PART_ROWS = 8                    # sublane-aligned rows per core-split in the partial-sums outputs


def _adaptive_loss_kernel(logits_ref, tgt_ref, *refs,
                          lambd, tile_n, tiles_per_core, n_valid, masked, per_sample):
    if per_sample:
        w_ref, s1_ref, s2_ref = refs
    else:
        s1_ref, s2_ref = refs

    c = pl.program_id(0)   # core-split index
    i = pl.program_id(1)   # row-tile index within this split

    # This split's partial accumulators live in its own output block (revisited across `i`).
    @pl.when(i == 0)
    def _():
        s1_ref[...] = jnp.zeros_like(s1_ref)
        s2_ref[...] = jnp.zeros_like(s2_ref)

    x = logits_ref[...]                                    # (tile_n, C), native dtype
    tgt = tgt_ref[...]                                     # (tile_n, 1), int32
    tn, nc = x.shape

    # Target pick + row max on the native dtype (exact: one nonzero per row / max of exact
    # values), with a (1, C) iota broadcast against tgt -- no (tile_n, C) iota, no one-hot.
    col = jax.lax.broadcasted_iota(jnp.int32, (1, nc), 1)
    onehot = col == tgt                                    # (tile_n, C) bool via broadcast
    picked = jnp.sum(jnp.where(onehot, x, jnp.zeros_like(x)),
                     axis=-1, keepdims=True).astype(jnp.float32)
    m = jnp.max(x, axis=-1, keepdims=True).astype(jnp.float32)

    # Stable log-sum-exp in f32.
    xf = x.astype(jnp.float32)
    lse = jnp.log(jnp.sum(jnp.exp(xf - m), axis=-1, keepdims=True)) + m
    ori = lse - picked                                     # (tile_n, 1) per-sample CE

    # Adaptive coefficient.
    if lambd == 1:
        powed = ori
    elif isinstance(lambd, int) and 2 <= lambd <= 4:
        powed = ori
        for _ in range(lambd - 1):
            powed = powed * ori
    else:
        powed = ori ** lambd
    # Exact reciprocal: approx would perturb coef/coef_sum numerics, and this op is not the
    # bottleneck (one (tile_n, 1) column per tile).
    coef = 1.0 / (powed + 1e-15)

    if masked:
        # Row validity from the *logical* tile index (clamped index_map may have re-read a
        # valid block for fully out-of-range tiles).  Select, not multiply: NaN-safe.
        row = (c * tiles_per_core + i) * tile_n + jax.lax.broadcasted_iota(jnp.int32, (tn, 1), 0)
        valid = row < n_valid
        coef = jnp.where(valid, coef, 0.0)
        w = jnp.where(valid, coef * ori, 0.0)
    else:
        w = coef * ori

    s1_ref[...] += jnp.sum(w, keepdims=True)       # S1_c += sum(coef * ori)   (scalar broadcast)
    s2_ref[...] += jnp.sum(coef, keepdims=True)    # S2_c += sum(coef)

    if per_sample:
        w_ref[...] = w


def _cdiv(a, b):
    return -(-a // b)


def _round_up(x, m):
    return ((x + m - 1) // m) * m


def _pick_tile_n(n, c, itemsize):
    # Per-row working set: 2x double-buffered native-dtype input block + ~1 native-dtype temp
    # (target-pick select) + ~3 f32 (tile_n, C) intermediates (upcast, shifted, exp).
    bytes_per_row = c * (3 * itemsize + 3 * 4) + 64
    t = _VMEM_BUDGET // max(1, bytes_per_row)
    t = max(8, (t // 8) * 8)
    # No point tiling beyond one core-split's share of rows.
    per_split = _round_up(_cdiv(n, _NUM_CORE_SPLITS), 8)
    return max(8, min(t, per_split))


def adaptive_loss(predict, target, *, lambd=1, reduction='mean', tile_n=None):
    """predict: [N, C] float logits (any float dtype), target: [N] integer class ids."""
    N, C = predict.shape
    if reduction not in ('mean', 'sum'):
        reduction = 'none'        # matches the PyTorch module: anything else -> unreduced
    per_sample = reduction == 'none'

    itemsize = jnp.dtype(predict.dtype).itemsize
    if tile_n is None:
        tile_n = _pick_tile_n(N, C, itemsize)
    tile_n = max(8, (tile_n // 8) * 8)

    g = _cdiv(N, tile_n)                          # row blocks actually present in the input
    tpc = _cdiv(g, _NUM_CORE_SPLITS)              # row tiles per core-split
    n_total = _NUM_CORE_SPLITS * tpc * tile_n     # rows covered by the grid (>= N)
    masked = (n_total != N)

    tgt = target.astype(jnp.int32).reshape(N, 1)

    kernel = functools.partial(
        _adaptive_loss_kernel,
        lambd=lambd, tile_n=tile_n, tiles_per_core=tpc,
        n_valid=N, masked=masked, per_sample=per_sample)

    def row_block(c, i):
        # Clamp so fully out-of-range tiles (odd tile count / ragged N) re-read a valid block
        # instead of issuing an OOB DMA; their rows are neutralized by the in-kernel mask.
        return (jnp.minimum(c * tpc + i, g - 1), 0)

    in_specs = [
        pl.BlockSpec((tile_n, C), row_block),
        pl.BlockSpec((tile_n, 1), row_block),
    ]

    parts_shape = jax.ShapeDtypeStruct((_NUM_CORE_SPLITS * _PART_ROWS, 128), jnp.float32)
    parts_spec = pl.BlockSpec((_PART_ROWS, 128), lambda c, i: (c, 0))

    if per_sample:
        out_shape = (jax.ShapeDtypeStruct((n_total, 1), jnp.float32), parts_shape, parts_shape)
        out_specs = (pl.BlockSpec((tile_n, 1), lambda c, i: (c * tpc + i, 0)),
                     parts_spec, parts_spec)
    else:
        out_shape = (parts_shape, parts_shape)
        out_specs = (parts_spec, parts_spec)

    out = pl.pallas_call(
        kernel,
        out_shape=out_shape,
        grid=(_NUM_CORE_SPLITS, tpc),
        in_specs=in_specs,
        out_specs=out_specs,
        compiler_params=pltpu.CompilerParams(
            dimension_semantics=("parallel", "arbitrary"),   # per-split partials -> no accum race
            vmem_limit_bytes=_VMEM_LIMIT),
    )(predict, tgt)

    if per_sample:
        w, s1p, s2p = out
    else:
        s1p, s2p = out
    s1 = jnp.sum(s1p[::_PART_ROWS, 0])     # combine per-core-split partials
    s2 = jnp.sum(s2p[::_PART_ROWS, 0])

    if per_sample:
        return w[:N, 0] * (jnp.float32(N) / s2)
    mean = s1 / s2                          # == sum(ad_loss) / N
    if reduction == 'mean':
        return mean
    return jnp.float32(N) * mean            # 'sum'


def _reference(predict, target, lambd=1, reduction='mean'):
    """Pure-JAX reference mirroring the PyTorch module (CE w/ reduction='none')."""
    logp = jax.nn.log_softmax(predict.astype(jnp.float32), axis=-1)
    ori = -jnp.take_along_axis(logp, target[:, None].astype(jnp.int32), axis=-1)[:, 0]
    coef = 1.0 / (ori ** lambd + 1e-15)
    ad = coef / coef.sum() * ori * predict.shape[0]
    if reduction == 'mean':
        return ad.mean()
    if reduction == 'sum':
        return ad.sum()
    return ad


if __name__ == "__main__":
    key = jax.random.PRNGKey(0)
    k1, k2, k3, k4, k5, k6 = jax.random.split(key, 6)

    # small, even-tile case: batch=8, num_classes=32
    N, C = 8, 32
    predict = jax.random.normal(k1, (N, C), dtype=jnp.float32)
    target = jax.random.randint(k2, (N,), 0, C, dtype=jnp.int32)

    out_mean = adaptive_loss(predict, target, lambd=1, reduction='mean')
    out_sum = adaptive_loss(predict, target, lambd=2, reduction='sum')
    out_none = adaptive_loss(predict, target, lambd=1, reduction='none')
    jax.block_until_ready((out_mean, out_sum, out_none))

    assert jnp.allclose(out_mean, _reference(predict, target, 1, 'mean'), atol=1e-5, rtol=1e-5)
    assert jnp.allclose(out_sum, _reference(predict, target, 2, 'sum'), atol=1e-5, rtol=1e-5)
    assert jnp.allclose(out_none, _reference(predict, target, 1, 'none'), atol=1e-5, rtol=1e-5)

    # ragged case (no wrapper pad anymore): batch=13, tile=8 -> last block partial, masked rows
    N2 = 13
    predict2 = jax.random.normal(k3, (N2, C), dtype=jnp.float32)
    target2 = jax.random.randint(k4, (N2,), 0, C, dtype=jnp.int32)

    out2_mean = adaptive_loss(predict2, target2, lambd=1, reduction='mean', tile_n=8)
    out2_none = adaptive_loss(predict2, target2, lambd=1, reduction='none', tile_n=8)
    jax.block_until_ready((out2_mean, out2_none))

    assert jnp.allclose(out2_mean, _reference(predict2, target2, 1, 'mean'), atol=1e-5, rtol=1e-5)
    assert jnp.allclose(out2_none, _reference(predict2, target2, 1, 'none'), atol=1e-5, rtol=1e-5)

    # odd tile count: batch=20, tile=8 -> 3 real tiles across 2 core-splits, one fully-masked tile
    N3 = 20
    predict3 = jax.random.normal(k5, (N3, C), dtype=jnp.float32)
    target3 = jax.random.randint(k6, (N3,), 0, C, dtype=jnp.int32)

    out3_mean = adaptive_loss(predict3, target3, lambd=1, reduction='mean', tile_n=8)
    out3_none = adaptive_loss(predict3, target3, lambd=2, reduction='none', tile_n=8)
    jax.block_until_ready((out3_mean, out3_none))

    assert jnp.allclose(out3_mean, _reference(predict3, target3, 1, 'mean'), atol=1e-5, rtol=1e-5)
    assert jnp.allclose(out3_none, _reference(predict3, target3, 2, 'none'), atol=1e-5, rtol=1e-5)

    # bf16 streaming path (native-dtype pick/max before f32 upcast)
    N4, C4 = 16, 128
    predict4 = jax.random.normal(k1, (N4, C4), dtype=jnp.bfloat16)
    target4 = jax.random.randint(k2, (N4,), 0, C4, dtype=jnp.int32)
    out4 = adaptive_loss(predict4, target4, lambd=1, reduction='mean')
    jax.block_until_ready(out4)
    assert jnp.allclose(out4, _reference(predict4, target4, 1, 'mean'), atol=1e-4, rtol=1e-4)

    print("KERNEL_OK")
</pallas_src>

<mosaic_0001>
module attributes {stable_mosaic.version = 11 : i64} {
  func.func @_adaptive_loss_kernel(%arg0: i32, %arg1: i32, %arg2: memref<8x32xf32, #tpu.memory_space<vmem>>, %arg3: memref<8x1xi32, #tpu.memory_space<vmem>>, %arg4: memref<8x128xf32, #tpu.memory_space<vmem>>, %arg5: memref<8x128xf32, #tpu.memory_space<vmem>>) attributes {dimension_semantics = [#tpu.dimension_semantics<parallel>, #tpu.dimension_semantics<arbitrary>], iteration_bounds = array<i64: 2, 1>, scalar_prefetch = 0 : i64, scratch_operands = 0 : i64, tpu.core_type = #tpu.core_type<tc>, window_params = [{transform_indices = @transform_0, window_bounds = array<i64: 8, 32>}, {transform_indices = @transform_1, window_bounds = array<i64: 8, 1>}, {transform_indices = @transform_2, window_bounds = array<i64: 8, 128>}, {transform_indices = @transform_3, window_bounds = array<i64: 8, 128>}]} {
    %c0_i32 = arith.constant 0 : i32
    %0 = arith.cmpi eq, %arg1, %c0_i32 : i32
    %1 = arith.extui %0 : i1 to i32
    %c0_i32_0 = arith.constant 0 : i32
    %2 = arith.cmpi ne, %1, %c0_i32_0 : i32
    scf.if %2 {
      %cst_22 = arith.constant 0.000000e+00 : f32
      %58 = vector.broadcast %cst_22 : f32 to vector<8x128xf32>
      %c0_23 = arith.constant 0 : index
      %c0_24 = arith.constant 0 : index
      %59 = vector.load %arg4[%c0_23, %c0_24] : memref<8x128xf32, #tpu.memory_space<vmem>>, vector<8x128xf32>
      tpu.vector_store %arg4[%c0_23, %c0_24], %58 {strides = array<i32>} : memref<8x128xf32, #tpu.memory_space<vmem>>, vector<8x128xf32>,
      %cst_25 = arith.constant 0.000000e+00 : f32
      %60 = vector.broadcast %cst_25 : f32 to vector<8x128xf32>
      %c0_26 = arith.constant 0 : index
      %c0_27 = arith.constant 0 : index
      %61 = vector.load %arg5[%c0_26, %c0_27] : memref<8x128xf32, #tpu.memory_space<vmem>>, vector<8x128xf32>
      tpu.vector_store %arg5[%c0_26, %c0_27], %60 {strides = array<i32>} : memref<8x128xf32, #tpu.memory_space<vmem>>, vector<8x128xf32>,
    } else {
    }
    %c0 = arith.constant 0 : index
    %c0_1 = arith.constant 0 : index
    %3 = vector.load %arg2[%c0, %c0_1] : memref<8x32xf32, #tpu.memory_space<vmem>>, vector<8x32xf32>
    %c0_2 = arith.constant 0 : index
    %c0_3 = arith.constant 0 : index
    %4 = vector.load %arg3[%c0_2, %c0_3] : memref<8x1xi32, #tpu.memory_space<vmem>>, vector<8x1xi32>
    %5 = tpu.iota {dimensions = array<i32: 1>} : vector<1x32xi32>
    %6 = vector.broadcast %5 : vector<1x32xi32> to vector<8x32xi32>
    %7 = vector.broadcast %4 : vector<8x1xi32> to vector<8x32xi32>
    %8 = arith.cmpi eq, %6, %7 : vector<8x32xi32>
    %cst = arith.constant 0.000000e+00 : f32
    %9 = vector.broadcast %cst : f32 to vector<8x32xf32>
    %10 = arith.select %8, %3, %9 : vector<8x32xi1>, vector<8x32xf32>
    %cst_4 = arith.constant dense<0.000000e+00> : vector<8xf32>
    %11 = vector.multi_reduction <add>, %10, %cst_4 [1] : vector<8x32xf32> to vector<8xf32>
    %12 = vector.shape_cast %11 : vector<8xf32> to vector<8x1xf32>
    %cst_5 = arith.constant dense<0xFF800000> : vector<8xf32>
    %13 = vector.multi_reduction <maximumf>, %3, %cst_5 [1] : vector<8x32xf32> to vector<8xf32>
    %14 = vector.shape_cast %13 : vector<8xf32> to vector<8x1xf32>
    %15 = vector.broadcast %14 : vector<8x1xf32> to vector<8x32xf32>
    %16 = arith.subf %3, %15 : vector<8x32xf32>
    %17 = math.exp %16 : vector<8x32xf32>
    %cst_6 = arith.constant dense<0.000000e+00> : vector<8xf32>
    %18 = vector.multi_reduction <add>, %17, %cst_6 [1] : vector<8x32xf32> to vector<8xf32>
    %19 = vector.shape_cast %18 : vector<8xf32> to vector<8x1xf32>
    %20 = math.log %19 : vector<8x1xf32>
    %21 = arith.addf %20, %14 : vector<8x1xf32>
    %22 = arith.subf %21, %12 : vector<8x1xf32>
    %cst_7 = arith.constant 1.000000e-15 : f32
    %23 = vector.broadcast %cst_7 : f32 to vector<8x1xf32>
    %24 = arith.addf %22, %23 : vector<8x1xf32>
    %cst_8 = arith.constant 1.000000e+00 : f32
    %25 = vector.broadcast %cst_8 : f32 to vector<8x1xf32>
    %26 = arith.divf %25, %24 : vector<8x1xf32>
    %c1_i32 = arith.constant 1 : i32
    %27 = arith.muli %arg0, %c1_i32 : i32
    %28 = arith.addi %27, %arg1 : i32
    %c8_i32 = arith.constant 8 : i32
    %29 = arith.muli %28, %c8_i32 : i32
    %30 = tpu.iota {dimensions = array<i32: 0>} : vector<8x1xi32>
    %31 = vector.broadcast %29 : i32 to vector<8x1xi32>
    %32 = arith.addi %31, %30 : vector<8x1xi32>
    %c8_i32_9 = arith.constant 8 : i32
    %33 = vector.broadcast %c8_i32_9 : i32 to vector<8x1xi32>
    %34 = arith.cmpi slt, %32, %33 : vector<8x1xi32>
    %cst_10 = arith.constant 0.000000e+00 : f32
    %35 = vector.broadcast %cst_10 : f32 to vector<8x1xf32>
    %36 = arith.select %34, %26, %35 : vector<8x1xi1>, vector<8x1xf32>
    %37 = arith.mulf %36, %22 : vector<8x1xf32>
    %cst_11 = arith.constant 0.000000e+00 : f32
    %38 = vector.broadcast %cst_11 : f32 to vector<8x1xf32>
    %39 = arith.select %34, %37, %38 : vector<8x1xi1>, vector<8x1xf32>
    %c0_12 = arith.constant 0 : index
    %c0_13 = arith.constant 0 : index
    %40 = vector.load %arg4[%c0_12, %c0_13] : memref<8x128xf32, #tpu.memory_space<vmem>>, vector<8x128xf32>
    %41 = vector.shape_cast %39 : vector<8x1xf32> to vector<1x8x1xf32>
    %cst_14 = arith.constant dense<0.000000e+00> : vector<1xf32>
    %42 = vector.multi_reduction <add>, %41, %cst_14 [1, 2] : vector<1x8x1xf32> to vector<1xf32>
    %43 = vector.shape_cast %42 : vector<1xf32> to vector<1x1x1xf32>
    %44 = vector.extract %43[0, 0, 0] : f32 from vector<1x1x1xf32>
    %45 = vector.broadcast %44 : f32 to vector<1x1xf32>
    %46 = vector.broadcast %45 : vector<1x1xf32> to vector<8x128xf32>
    %47 = arith.addf %40, %46 : vector<8x128xf32>
    %c0_15 = arith.constant 0 : index
    %c0_16 = arith.constant 0 : index
    %48 = vector.load %arg4[%c0_15, %c0_16] : memref<8x128xf32, #tpu.memory_space<vmem>>, vector<8x128xf32>
    tpu.vector_store %arg4[%c0_15, %c0_16], %47 {strides = array<i32>} : memref<8x128xf32, #tpu.memory_space<vmem>>, vector<8x128xf32>,
    %c0_17 = arith.constant 0 : index
    %c0_18 = arith.constant 0 : index
    %49 = vector.load %arg5[%c0_17, %c0_18] : memref<8x128xf32, #tpu.memory_space<vmem>>, vector<8x128xf32>
    %50 = vector.shape_cast %36 : vector<8x1xf32> to vector<1x8x1xf32>
    %cst_19 = arith.constant dense<0.000000e+00> : vector<1xf32>
    %51 = vector.multi_reduction <add>, %50, %cst_19 [1, 2] : vector<1x8x1xf32> to vector<1xf32>
    %52 = vector.shape_cast %51 : vector<1xf32> to vector<1x1x1xf32>
    %53 = vector.extract %52[0, 0, 0] : f32 from vector<1x1x1xf32>
    %54 = vector.broadcast %53 : f32 to vector<1x1xf32>
    %55 = vector.broadcast %54 : vector<1x1xf32> to vector<8x128xf32>
    %56 = arith.addf %49, %55 : vector<8x128xf32>
    %c0_20 = arith.constant 0 : index
    %c0_21 = arith.constant 0 : index
    %57 = vector.load %arg5[%c0_20, %c0_21] : memref<8x128xf32, #tpu.memory_space<vmem>>, vector<8x128xf32>
    tpu.vector_store %arg5[%c0_20, %c0_21], %56 {strides = array<i32>} : memref<8x128xf32, #tpu.memory_space<vmem>>, vector<8x128xf32>,
    return
  }
  func.func @transform_0(%arg0: i32, %arg1: i32) -> (i32, i32) {
    %c1_i32 = arith.constant 1 : i32
    %0 = arith.muli %arg0, %c1_i32 : i32
    %1 = arith.addi %0, %arg1 : i32
    %c0_i32 = arith.constant 0 : i32
    %2 = arith.minsi %1, %c0_i32 : i32
    %c0_i32_0 = arith.constant 0 : i32
    %c0_i32_1 = arith.constant 0 : i32
    return %2, %c0_i32_0 : i32, i32
  }
  func.func @transform_1(%arg0: i32, %arg1: i32) -> (i32, i32) {
    %c1_i32 = arith.constant 1 : i32
    %0 = arith.muli %arg0, %c1_i32 : i32
    %1 = arith.addi %0, %arg1 : i32
    %c0_i32 = arith.constant 0 : i32
    %2 = arith.minsi %1, %c0_i32 : i32
    %c0_i32_0 = arith.constant 0 : i32
    %c0_i32_1 = arith.constant 0 : i32
    return %2, %c0_i32_0 : i32, i32
  }
  func.func @transform_2(%arg0: i32, %arg1: i32) -> (i32, i32) {
    %c0_i32 = arith.constant 0 : i32
    %c0_i32_0 = arith.constant 0 : i32
    return %arg0, %c0_i32 : i32, i32
  }
  func.func @transform_3(%arg0: i32, %arg1: i32) -> (i32, i32) {
    %c0_i32 = arith.constant 0 : i32
    %c0_i32_0 = arith.constant 0 : i32
    return %arg0, %c0_i32 : i32, i32
  }
}

</mosaic_0001>

<bundles_post_ra>
// kernel: tpu_custom_call.1
= control target key start
LH: loop header
LB: loop body
LE: loop exit
PB: predicated region body
PF: predicated region fallthrough
CT: control target
= control target key end

     0   :  { %9 = vsyncpa [#allocation3], 0  ;;  %s860_s0 = inlined_call_operand.vmem [shape: f32[8,32], index: 0, kind: input, shape index: {}]   ;;  %s861_s1 = inlined_call_operand.vmem [shape: s32[8,1], index: 1, kind: input, shape index: {}]   ;;  %s862_s2 = inlined_call_operand.hbm [shape: f32[16,128], index: 2, kind: output, shape index: {0}]   ;;  %s863_s3 = inlined_call_operand.hbm [shape: f32[16,128], index: 3, kind: output, shape index: {1}]  }
   0x1   :  { %11 = vsyncpa [#allocation3 + $0x1], 0 }
   0x2   :  { %12 = vsyncpa [#allocation5], 0 }
   0x3   :  { %14 = vsyncpa [#allocation5 + $0x1], 0  ;;  %s695_s12 = smov 0   ;;  %s697_s13 = smov 0  }
   0x4   :  { %s699_s14 = smov 0   ;;  %s701_s15 = smov 0  }
   0x5   :  { %s703_s16 = smov 0   ;;  %s705_s17 = smov 0  }
   0x6 LB: > { %s465_s18 = sadd.s32 4294967295, %s670_s17   ;;  %s466_s19 = sadd.s32 4294967294, %s670_s17   ;;  %s670_s17 = sphi %s705_s17, %s20_s17   ;;  %s666_s16 = sphi %s703_s16, %s870_s16   ;;  %s662_s15 = sphi %s701_s15, %s869_s15   ;;  %s658_s14 = sphi %s699_s14, %s868_s14   ;;  %s654_s13 = sphi %s697_s13, %s867_s13   ;;  %s650_s12 = sphi %s695_s12, %s866_s12  }
   0x7   : > { %s32_s20 = sadd.s32 1, %s666_s16  ;;  %s103_s21 = sadd.s32 1, %s658_s14 }
   0x8   : > { %p34_p0 = scmp.ge.s32.totalorder %s32_s20, 2  ;;  %p113_p1 = scmp.ne.s32.totalorder %s658_s14, %s654_s13 }
   0x9   : > { %p114_p2 = scmp.eq.s32.totalorder %s465_s18, 1  ;;  %p119_p3 = scmp.ne.s32.totalorder %s654_s13, %s650_s12 }
   0xa   : > { %s872_s20 = smov (%p34_p0, %s32_s20), 0  ;;  %p120_p5 = scmp.eq.s32.totalorder %s466_s19, 1 }
   0xb   : > { %p735_p4 = por %p114_p2, %p113_p1  ;;  %s100_s23 = ssub.s32 %s666_s16, %s872_s20 }
   0xc   : > { %p469_p6 = scmp.ge.s32.totalorder %s670_s17, 1  ;;  %p101_p7 = scmp.eq.s32.totalorder %s100_s23, 0 }
   0xd   : > { %p742_p8 = por %p120_p5, %p119_p3  ;;  %p190_p9 = scmp.lt.s32.totalorder %s670_s17, 3 }
   0xe   : > { %s748_s25 = scalar_select %p101_p7, %s658_s14, %s103_s21  }
   0xf   : > { %p191_p10 = pnand %p469_p6, %p190_p9 }
  0x10   : > { %p229_p11 = scmp.lt.s32.totalorder (!%p191_p10), %s662_s15, 0  ;;  %v672_v0 = vmov (!%p191_p10), 0   ;;  %vm263_vm0 = vcmask (!%p191_p10), 261120   ;;  %v256_v7 = vlaneseq (!%p191_p10)  ;;  %s480_s7 = sshll.u32 (!%p191_p10), %s662_s15, 3  ;;  %vm294_vm3 = vcmask (!%p191_p10), 7168  }
  0x11   : > { %194 = sbr.rel (%p191_p10) target bundleno = 611 (0x263), region = 28  ;;  %553 = vset.pattern.permute.xlu0 (!%p191_p10), %v672_v0  ;;  %v287_v22 = vstv (!%p191_p10), %s480_s7  ;;  %s763_s8 = sand.u32 (!%p191_p10), 1, %s654_s13  }
  0x12   : > { %v257_v8 = vand.u32 (!%p191_p10), 127, %v256_v7  ;;  %v286_v21 = vshrl.u32 (!%p191_p10), %v256_v7, 7  ;;  %s470_s9 = sshll.u32 (!%p191_p10), %s763_s8, 3  ;;  %s483_s10 = sshll.u32 (!%p191_p10), %s662_s15, 7 }
  0x13   : > { %s220_s11 = scalar_lea.vmem (!%p191_p10), [#allocation2], %s470_s9  ;;  %s673_s5 = smov (!%p191_p10), [#allocation2]  }
  0x14   : > { %v288_v23 = vadd.s32 (!%p191_p10), %v287_v22, %v286_v21  ;;  %s341_s18 = sshll.u32 (!%p191_p10), %s220_s11, 4  ;;  %s774_s18 = int_to_ptr.vmem [resolvable:$true] %s341_s18 }
  0x15   : > { %s560_s4 = scalar_lea.vmem (!%p191_p10), %s774_s18, 128 }
  0x16   : > { %vm289_vm2 = vcmp.lt.s32.totalorder (!%p191_p10), %v288_v23, 8  ;;  %p561_p12 = scmp.ne.s32.totalorder (!%p191_p10), %s774_s18, %s560_s4 }
  0x18   : > { %s230_s26 = scalar_select %p229_p11, %s662_s15, 0 }
  0x19   : > { %p562_p13 = pnand %p561_p12, %p735_p4 }
  0x1a   : > { %s874_s26 = smov (!%p229_p11, %s230_s26), 0 }
  0x1b   : > { %s475_s27 = sshll.u32 %s874_s26, 3  ;;  %s772_s26 = scalar_lea.hbm %s862_s2, %s483_s10 }
  0x1c   : > { %s234_s30 = scalar_lea.vmem %s860_s0, %s475_s27  ;;  %s244_s6 = scalar_lea.vmem %s861_s1, %s475_s27 }
  0x1d   : > { %v254_v1 = vld [vmem:[%s234_s30] sm:$0xff]  ;;  %s776_s27 = scalar_lea.vmem [#allocation4], %s470_s9  ;;  %s323_s30 = scalar_lea.sflag [#allocation3], %s763_s8 }
  0x1e   : > { %v267_v2 = vsel %vm263_vm0, %v254_v1, -inf  ;;  %v255_v3 = vld [vmem:[%s244_s6] sm:$0xff]  ;;  %s354_s28 = sshll.u32 %s776_s27, 4  ;;  %p563_p0 = pneg %p562_p13  ;;  %s813_s28 = int_to_ptr.vmem [resolvable:$true] %s354_s28 }
  0x1f   : > { %268 = vmax.xlane.f32.xlu0 %v267_v2  ;;  %s564_s6 = sshll.u32 %s673_s5, 4  ;;  %s565_s6 = int_to_ptr.vmem [resolvable:$false] %s564_s6 }
  0x20   : > { %s566_s7 = scalar_lea.vmem %s565_s6, 256  ;;  %p567_p1 = scmp.lt.s32.totalorder %s774_s18, %s565_s6 }
  0x21   : > { %p568_p2 = scmp.lt.s32.totalorder %s566_s7, %s560_s4 }
  0x23   : > { %p569_p3 = por %p568_p2, %p567_p1 }
  0x25   : > { %p570_p5 = pnand %p569_p3, %p563_p0 }
  0x35   : > { %259 = vperm.xlu0 %553, %v255_v3  }
  0xac   : > { %v269_v4 = vpop.xlane.xlu0 %268 }
  0xad   : > { %v270_v5 = vsub.f32 %v254_v1, %v269_v4 }
  0xaf   : > { %v271_v6 = vmul.f32 1.442695, %v270_v5 }
  0xb1   : > { %554 = vpow2.f32 %v271_v6 }
  0xb4   : > { %v260_v9 = vpop.permute.xlu0 %259 }
  0xb5   : > { %vm261_vm1 = vcmp.eq.s32.totalorder %v257_v8, %v260_v9 }
  0xb6   : > { %v262_v11 = vsel %vm261_vm1, %v254_v1, 0.0 }
  0xb7   : > { %v264_v13 = vsel %vm263_vm0, %v262_v11, 0.0 }
  0xbb   : > { %v555_v10 = vpop.eup %554 }
  0xbc   : > { %v273_v12 = vsel %vm263_vm0, %v555_v10, 0.0 }
  0xbd   : > { %274 = vadd.xlane.f32.xlu1 %v273_v12 }
  0xc1   : > { %265 = vadd.xlane.f32.xlu1 %v264_v13 }
 0x14a   : > { %v275_v14 = vpop.xlane.xlu1 %274 }
 0x14b   : > { %556 = vlog2.f32 %v275_v14 }
 0x14e   : > { %v266_v17 = vpop.xlane.xlu1 %265 }
 0x155   : > { %v557_v15 = vpop.eup %556 }
 0x156   : > { %v277_v16 = vmul.f32 0.6931472, %v557_v15 }
 0x158   : > { %v278_v18 = vadd.f32 %v277_v16, %v269_v4 }
 0x15a   : > { %v279_v19 = vsub.f32 %v278_v18, %v266_v17 }
 0x15c   : > { %v280_v20 = vadd.f32 1e-15, %v279_v19 }
 0x15e   : > { %558 = vrcp.f32 %v280_v20 }
 0x168   : > { %v559_v24 = vpop.eup %558 }
 0x169   : > { %v290_v25 = vsel %vm289_vm2, %v559_v24, 0.0 }
 0x16a   : > { %v291_v26 = vmul.f32 %v290_v25, %v279_v19  ;;  %v309_v29 = vsel %vm294_vm3, %v290_v25, 0.0 }
 0x16c   : > { %v292_v27 = vsel %vm289_vm2, %v291_v26, 0.0 }
 0x16d   : > { %v295_v28 = vsel %vm294_vm3, %v292_v27, 0.0 }
 0x16e   : > { %296 = vadd.xlane.f32.xlu1 %v295_v28 }
 0x172   : > { %310 = vadd.xlane.f32.xlu1 %v309_v29 }
 0x1fb   : > { %v297_v30 = vpop.xlane.xlu1 %296 }
 0x1fc   : > { %v298_v31 = vrot.slane %v297_v30, 4 }
 0x1fe   : > { %v299_v32 = vadd.f32 %v298_v31, %v297_v30 }
 0x1ff   : > { %v311_v33 = vpop.xlane.xlu1 %310 }
 0x200   : > { %v300_v34 = vrot.slane %v299_v32, 2  ;;  %v312_v35 = vrot.slane %v311_v33, 4 }
 0x202   : > { %v313_v36 = vadd.f32 %v312_v35, %v311_v33  ;;  %v301_v37 = vadd.f32 %v300_v34, %v299_v32 }
 0x204   : > { %v314_v38 = vrot.slane %v313_v36, 2  ;;  %v302_v39 = vrot.slane %v301_v37, 1 }
 0x206   : > { %v315_v40 = vadd.f32 %v314_v38, %v313_v36  ;;  %v303_v41 = vadd.f32 %v302_v39, %v301_v37 }
 0x208   : > { %487 = vpush %v303_v41  ;;  %v316_v42 = vrot.slane %v315_v40, 1 }
 0x20a   : > { %v317_v43 = vadd.f32 %v316_v42, %v315_v40 }
 0x20c   : > { %489 = vpush %v317_v43 }
 0x239   : > { %s488_s19 = spop %487 }
 0x23a   : > { %v305_v44 = vstv %s488_s19 }
 0x23b   : > { %307 = vst [vmem:[%s220_s11] sm:$0xff] %v305_v44 }
 0x23d   : > { %s779_s29 = spop %489 }
 0x23e   : > { %v319_v45 = vstv %s779_s29 }
 0x23f   : > { %573 = shalt.err (!%p570_p5)
}
 0x240   : > { %s574_s9 = scalar_lea.hbm %s772_s26, 128  ;;  %s578_s21 = scalar_lea.hbm %s862_s2, 256 }
 0x241   : > { %p575_p6 = scmp.ne.s32.totalorder %s772_s26, %s574_s9  ;;  %p579_p10 = scmp.lt.u32.totalorder %s772_s26, %s862_s2 }
 0x242   : > { %p580_p11 = scmp.lt.u32.totalorder %s578_s21, %s574_s9  ;;  %p582_p13 = scmp.lt.u32.totalorder %s574_s9, %s772_s26 }
 0x243   : > { %p576_p7 = pnand %p575_p6, %p735_p4 }
 0x244   : > { %p581_p12 = por %p580_p11, %p579_p10 }
 0x245   : > { %p577_p9 = pneg %p576_p7 }
 0x246   : > { %p583_p0 = por %p582_p13, %p581_p12 }
 0x248   : > { %p584_p1 = pnand %p583_p0, %p577_p9 }
 0x24a   : > { %587 = shalt.err (!%p584_p1)
}
 0x24b   : > { %491 = dma.vmem_to_hbm [thread:$0]  (%p735_p4), %s774_s18, 128, %s772_s26, %s323_s30   ;;  %321 = vst [vmem:[%s776_s27] sm:$0xff] %v319_v45 }
 0x24c   : > { %s809_s6 = scalar_lea.hbm %s863_s3, %s483_s10  ;;  %s328_s7 = scalar_lea.sflag [#allocation5], %s763_s8 }
 0x24d   : > { %s588_s9 = scalar_lea.vmem %s813_s28, 128  ;;  %s674_s18 = smov [#allocation4]  }
 0x24e   : > { %p589_p2 = scmp.ne.s32.totalorder %s813_s28, %s588_s9  ;;  %s592_s15 = sshll.u32 %s674_s18, 4  ;;  %s593_s15 = int_to_ptr.vmem [resolvable:$false] %s592_s15 }
 0x24f   : > { %s594_s26 = scalar_lea.vmem %s593_s15, 256  ;;  %p595_p6 = scmp.lt.s32.totalorder %s813_s28, %s593_s15 }
 0x250   : > { %p590_p3 = pnand %p589_p2, %p735_p4  ;;  %p596_p7 = scmp.lt.s32.totalorder %s594_s26, %s588_s9 }
 0x252   : > { %p591_p5 = pneg %p590_p3  ;;  %p597_p9 = por %p596_p7, %p595_p6 }
 0x254   : > { %p598_p10 = pnand %p597_p9, %p591_p5 }
 0x256   : > { %601 = shalt.err (!%p598_p10)
}
 0x257   : > { %s602_s8 = scalar_lea.hbm %s809_s6, 128  ;;  %s606_s30 = scalar_lea.hbm %s863_s3, 256 }
 0x258   : > { %p603_p11 = scmp.ne.s32.totalorder %s809_s6, %s602_s8  ;;  %p607_p0 = scmp.lt.u32.totalorder %s809_s6, %s863_s3 }
 0x259   : > { %p608_p1 = scmp.lt.u32.totalorder %s606_s30, %s602_s8  ;;  %p610_p3 = scmp.lt.u32.totalorder %s602_s8, %s809_s6 }
 0x25a   : > { %p604_p12 = pnand %p603_p11, %p735_p4 }
 0x25b   : > { %p609_p2 = por %p608_p1, %p607_p0 }
 0x25c   : > { %p605_p13 = pneg %p604_p12 }
 0x25d   : > { %p611_p5 = por %p610_p3, %p609_p2 }
 0x25f   : > { %p612_p6 = pnand %p611_p5, %p605_p13 }
 0x261   : > { %615 = shalt.err (!%p612_p6)
}
 0x262   : > { %492 = dma.vmem_to_hbm [thread:$0]  (%p735_p4), %s813_s28, 128, %s809_s6, %s328_s7  }
 0x263 PF: > { %p502_p7 = scmp.ge.s32.totalorder %s670_s17, 2  ;;  %s366_s21 = sand.u32 1, %s650_s12  }
 0x264   : > { %s367_s23 = scalar_lea.sflag [#allocation3], %s366_s21 }
 0x265   : > { %p496_p9 = pnand %p502_p7, %p742_p8 }
 0x267   : > { %641 = dma.done.wait (!%p496_p9), %s367_s23, 128  }
 0x268   : > { %643 = vsyncadd (!%p496_p9), %s367_s23, 4294967168  ;;  %s376_s29 = scalar_lea.sflag [#allocation5], %s366_s21 }
 0x269   : > { %645 = dma.done.wait (!%p496_p9), %s376_s29, 128  }
 0x26a   : > { %647 = vsyncadd (!%p496_p9), %s376_s29, 4294967168  ;;  %s20_s17 = sadd.s32 1, %s670_s17   ;;  %s866_s12 = smov %s654_s13 }
 0x26b   : > { %p17_p10 = scmp.ge.s32.totalorder %s20_s17, 4   ;;  %s867_s13 = smov %s658_s14 }
 0x26c   : > { %s868_s14 = smov %s748_s25  ;;  %s869_s15 = smov %s666_s16 }
 0x26d   : > { %s870_s16 = smov %s872_s20  ;;  %19 = sbr.rel (!%p17_p10) target bundleno = 6 (0x6), region = 87 }
 0x274   :  { %381 = vsyncpa [#allocation3], 1 }
 0x275   :  { %383 = vsyncpa [#allocation3 + $0x1], 1 }
 0x276   :  { %384 = vsyncpa [#allocation5], 1 }
 0x277   :  { %386 = vsyncpa [#allocation5 + $0x1], 1 }

</bundles_post_ra>
